<compile_context>
chip_gen: v7x
topology: tpu7x:2x2x1
jax: 0.10.0
libtpu: 0.0.40
codegen_flags: <defaults>
</compile_context>

<pallas_src>
import jax
import jax.numpy as jnp
from jax.experimental import pallas as pl
from jax.experimental.pallas import tpu as pltpu


def _round_up(x, m):
    return ((x + m - 1) // m) * m


# ---------------------------------------------------------------------------
# Kernel: fused 3-layer MLP on one (tb, latent_dim) batch tile.
# ---------------------------------------------------------------------------
def _decoder_kernel(x_ref, w1_ref, b1_ref, w2_ref, b2_ref, w3_ref, b3_ref,
                    o_ref):
    cdt = w1_ref.dtype  # MXU operand dtype (bf16 when prepared, else f32)
    # ---- fc1 + ReLU (f32 accumulate, f32 epilogue) ----
    h = jnp.dot(x_ref[...].astype(cdt), w1_ref[...],
                preferred_element_type=jnp.float32)
    h = jnp.maximum(h + b1_ref[...], 0.0)
    # ---- fc2 + ReLU ----
    h = jnp.dot(h.astype(cdt), w2_ref[...],
                preferred_element_type=jnp.float32)
    h = jnp.maximum(h + b2_ref[...], 0.0)
    # ---- fc3 + tanh (tanh runs on the EUP, off the VALU critical path) ----
    h = jnp.dot(h.astype(cdt), w3_ref[...],
                preferred_element_type=jnp.float32)
    o_ref[...] = jnp.tanh(h + b3_ref[...]).astype(o_ref.dtype)


# ---------------------------------------------------------------------------
# One-time parameter preparation (hoisted out of the per-call path).
# ---------------------------------------------------------------------------
def prepare_decoder_params(params, *, use_bf16=True):
    """Cast weights once for the MXU; biases stay f32 for the VPU epilogue."""
    w1, b1, w2, b2, w3, b3 = params
    if use_bf16:
        w1, w2, w3 = (w.astype(jnp.bfloat16) for w in (w1, w2, w3))
    return (w1, b1, w2, b2, w3, b3)


def _default_block_b():
    """Generation-aware default batch tile (v5e has a 16 MiB scoped-VMEM
    default; v6e/v7x default to 32 MiB scoped)."""
    try:
        kind = jax.devices()[0].device_kind.lower()
    except Exception:
        kind = ""
    if "v5 lite" in kind or "v5e" in kind or "v5litepod" in kind:
        return 2048
    return 4096


# ---------------------------------------------------------------------------
# Wrapper
# ---------------------------------------------------------------------------
def decoder_forward(x, params, *, block_b=None, out_dtype=jnp.float32):
    """x: (B, latent_dim) float32. params: prepared (w1,b1,w2,b2,w3,b3).
    Returns (B, airfoil_dim) in out_dtype (default float32)."""
    w1, b1, w2, b2, w3, b3 = params
    B, latent_dim = x.shape
    h1_dim = w1.shape[1]
    h2_dim = w2.shape[1]
    out_dim = w3.shape[1]

    if block_b is None:
        block_b = _default_block_b()

    # Batch tile selection:
    #   * aim for >= 2 grid steps so v7x's two TensorCores both get work
    #     ("parallel" axis), while keeping tiles big enough to amortize the
    #     ~0.35 us per-step overhead;
    #   * tb multiple of 8 (sublane constraint) unless it covers the full
    #     batch, in which case the full-extent block is always legal.
    tb = _round_up(pl.cdiv(B, 2), 8)
    tb = min(tb, block_b)
    if tb >= B:
        tb = B
    grid = (pl.cdiv(B, tb),)

    flops = 2 * B * (latent_dim * h1_dim + h1_dim * h2_dim + h2_dim * out_dim)
    bytes_accessed = (
        x.size * x.dtype.itemsize
        + sum(a.size * a.dtype.itemsize for a in (w1, b1, w2, b2, w3, b3))
        + B * out_dim * jnp.dtype(out_dtype).itemsize)

    # Constant block index -> array stays resident in VMEM across grid steps.
    def resident(arr):
        return pl.BlockSpec(arr.shape, lambda i: (0, 0))

    out = pl.pallas_call(
        _decoder_kernel,
        out_shape=jax.ShapeDtypeStruct((B, out_dim), out_dtype),
        grid=grid,
        in_specs=[
            # latent_dim (=32) is the full last dim -> legal, no lane padding.
            pl.BlockSpec((tb, latent_dim), lambda i: (i, 0)),
            resident(w1), resident(b1),
            resident(w2), resident(b2),
            resident(w3), resident(b3),
        ],
        # Full out_dim block (masked vst) -> no column padding, no wrapper
        # slice, half the output HBM bytes of a 128-padded slab.
        out_specs=pl.BlockSpec((tb, out_dim), lambda i: (i, 0)),
        compiler_params=pltpu.CompilerParams(
            dimension_semantics=("parallel",)),
        cost_estimate=pl.CostEstimate(
            flops=flops,
            transcendentals=B * out_dim,
            bytes_accessed=bytes_accessed),
    )(x, w1, b1, w2, b2, w3, b3)

    return out


# ---------------------------------------------------------------------------
# Init + references
# ---------------------------------------------------------------------------
def init_decoder_params(key, latent_dim, airfoil_dim):
    """Deterministic init mimicking nn.Linear's U(-1/sqrt(fan_in), +1/sqrt(fan_in)).
    Weights stored as (in_features, out_features) (i.e. PyTorch W.T)."""
    dims = [(latent_dim, 128), (128, 256), (256, airfoil_dim)]
    params = []
    for (fan_in, fan_out) in dims:
        key, kw, kb = jax.random.split(key, 3)
        bound = 1.0 / jnp.sqrt(fan_in)
        w = jax.random.uniform(kw, (fan_in, fan_out), jnp.float32,
                               minval=-bound, maxval=bound)
        b = jax.random.uniform(kb, (1, fan_out), jnp.float32,
                               minval=-bound, maxval=bound)
        params.extend([w, b])
    return tuple(params)


def decoder_reference(x, params):
    """Pure-JAX f32 reference of the PyTorch forward pass."""
    w1, b1, w2, b2, w3, b3 = params
    h = jnp.maximum(x @ w1 + b1, 0.0)
    h = jnp.maximum(h @ w2 + b2, 0.0)
    return jnp.tanh(h @ w3 + b3)


def decoder_reference_bf16(x, params):
    """Reference emulating the kernel's precision (bf16 MXU operands, f32 acc)."""
    w1, b1, w2, b2, w3, b3 = params
    c = jnp.bfloat16
    h = jnp.maximum(
        jnp.dot(x.astype(c), w1.astype(c),
                preferred_element_type=jnp.float32) + b1, 0.0)
    h = jnp.maximum(
        jnp.dot(h.astype(c), w2.astype(c),
                preferred_element_type=jnp.float32) + b2, 0.0)
    return jnp.tanh(
        jnp.dot(h.astype(c), w3.astype(c),
                preferred_element_type=jnp.float32) + b3)


if __name__ == "__main__":
    latent_dim = 32
    airfoil_dim = 64
    batch = 8

    key = jax.random.PRNGKey(0)
    key, kx = jax.random.split(key)
    x = jax.random.normal(kx, (batch, latent_dim), jnp.float32)
    params_f32 = init_decoder_params(key, latent_dim, airfoil_dim)
    params = prepare_decoder_params(params_f32, use_bf16=True)  # one-time cast

    out = jax.block_until_ready(decoder_forward(x, params))
    assert out.shape == (batch, airfoil_dim)
    assert out.dtype == jnp.float32

    ref_bf16 = decoder_reference_bf16(x, params_f32)
    ref_f32 = decoder_reference(x, params_f32)
    assert jnp.allclose(out, ref_bf16, atol=2e-3, rtol=2e-3), \
        "mismatch vs bf16-emulated reference"
    assert jnp.allclose(out, ref_f32, atol=5e-2, rtol=5e-2), \
        "mismatch vs f32 reference"

    # Exercise the multi-step batch grid + ragged last block (grid=(2,), tb=504).
    x_big = jax.random.normal(jax.random.PRNGKey(1), (1000, latent_dim),
                              jnp.float32)
    out_big = jax.block_until_ready(decoder_forward(x_big, params))
    assert out_big.shape == (1000, airfoil_dim)
    ref_big = decoder_reference_bf16(x_big, params_f32)
    assert jnp.allclose(out_big, ref_big, atol=2e-3, rtol=2e-3), \
        "mismatch vs reference (large batch)"

    # Optional bf16-output path (halves output HBM traffic if consumer allows).
    out_bf16 = jax.block_until_ready(
        decoder_forward(x_big, params, out_dtype=jnp.bfloat16))
    assert out_bf16.dtype == jnp.bfloat16
    assert jnp.allclose(out_bf16.astype(jnp.float32), ref_big,
                        atol=1e-2, rtol=1e-2), "mismatch (bf16 output)"

    print("KERNEL_OK")
</pallas_src>

<mosaic_0001>
module attributes {stable_mosaic.version = 11 : i64} {
  func.func @_decoder_kernel(%arg0: i32, %arg1: memref<8x32xf32, #tpu.memory_space<vmem>>, %arg2: memref<32x128xbf16, #tpu.memory_space<vmem>>, %arg3: memref<1x128xf32, #tpu.memory_space<vmem>>, %arg4: memref<128x256xbf16, #tpu.memory_space<vmem>>, %arg5: memref<1x256xf32, #tpu.memory_space<vmem>>, %arg6: memref<256x64xbf16, #tpu.memory_space<vmem>>, %arg7: memref<1x64xf32, #tpu.memory_space<vmem>>, %arg8: memref<8x64xf32, #tpu.memory_space<vmem>>) attributes {dimension_semantics = [#tpu.dimension_semantics<parallel>], iteration_bounds = array<i64: 1>, scalar_prefetch = 0 : i64, scratch_operands = 0 : i64, tpu.core_type = #tpu.core_type<tc>, window_params = [{transform_indices = @transform_0, window_bounds = array<i64: 8, 32>}, {pipeline_mode = #tpu.pipeline_mode<synchronous>, transform_indices = @transform_1, window_bounds = array<i64: 32, 128>}, {pipeline_mode = #tpu.pipeline_mode<synchronous>, transform_indices = @transform_2, window_bounds = array<i64: 1, 128>}, {pipeline_mode = #tpu.pipeline_mode<synchronous>, transform_indices = @transform_3, window_bounds = array<i64: 128, 256>}, {pipeline_mode = #tpu.pipeline_mode<synchronous>, transform_indices = @transform_4, window_bounds = array<i64: 1, 256>}, {pipeline_mode = #tpu.pipeline_mode<synchronous>, transform_indices = @transform_5, window_bounds = array<i64: 256, 64>}, {pipeline_mode = #tpu.pipeline_mode<synchronous>, transform_indices = @transform_6, window_bounds = array<i64: 1, 64>}, {transform_indices = @transform_7, window_bounds = array<i64: 8, 64>}]} {
    %c0 = arith.constant 0 : index
    %c0_0 = arith.constant 0 : index
    %0 = vector.load %arg1[%c0, %c0_0] : memref<8x32xf32, #tpu.memory_space<vmem>>, vector<8x32xf32>
    %1 = arith.truncf %0 : vector<8x32xf32> to vector<8x32xbf16>
    %c0_1 = arith.constant 0 : index
    %c0_2 = arith.constant 0 : index
    %2 = vector.load %arg2[%c0_1, %c0_2] : memref<32x128xbf16, #tpu.memory_space<vmem>>, vector<32x128xbf16>
    %cst = arith.constant dense<0.000000e+00> : vector<8x128xf32>
    %3 = tpu.matmul %1, %2, %cst {dimension_numbers = #tpu.dot_dimension_numbers<[1], [0], [0], [1], [0, 0, 1, 1], [], []>} : vector<8x32xbf16>, vector<32x128xbf16>, vector<8x128xf32> -> vector<8x128xf32>
    %c0_3 = arith.constant 0 : index
    %c0_4 = arith.constant 0 : index
    %4 = vector.load %arg3[%c0_3, %c0_4] : memref<1x128xf32, #tpu.memory_space<vmem>>, vector<1x128xf32>
    %5 = vector.broadcast %4 : vector<1x128xf32> to vector<8x128xf32>
    %6 = arith.addf %3, %5 : vector<8x128xf32>
    %cst_5 = arith.constant 0.000000e+00 : f32
    %7 = vector.broadcast %cst_5 : f32 to vector<8x128xf32>
    %8 = arith.maximumf %6, %7 : vector<8x128xf32>
    %9 = arith.truncf %8 : vector<8x128xf32> to vector<8x128xbf16>
    %c0_6 = arith.constant 0 : index
    %c0_7 = arith.constant 0 : index
    %10 = vector.load %arg4[%c0_6, %c0_7] : memref<128x256xbf16, #tpu.memory_space<vmem>>, vector<128x256xbf16>
    %cst_8 = arith.constant dense<0.000000e+00> : vector<8x256xf32>
    %11 = tpu.matmul %9, %10, %cst_8 {dimension_numbers = #tpu.dot_dimension_numbers<[1], [0], [0], [1], [0, 0, 1, 1], [], []>} : vector<8x128xbf16>, vector<128x256xbf16>, vector<8x256xf32> -> vector<8x256xf32>
    %c0_9 = arith.constant 0 : index
    %c0_10 = arith.constant 0 : index
    %12 = vector.load %arg5[%c0_9, %c0_10] : memref<1x256xf32, #tpu.memory_space<vmem>>, vector<1x256xf32>
    %13 = vector.broadcast %12 : vector<1x256xf32> to vector<8x256xf32>
    %14 = arith.addf %11, %13 : vector<8x256xf32>
    %cst_11 = arith.constant 0.000000e+00 : f32
    %15 = vector.broadcast %cst_11 : f32 to vector<8x256xf32>
    %16 = arith.maximumf %14, %15 : vector<8x256xf32>
    %17 = arith.truncf %16 : vector<8x256xf32> to vector<8x256xbf16>
    %c0_12 = arith.constant 0 : index
    %c0_13 = arith.constant 0 : index
    %18 = vector.load %arg6[%c0_12, %c0_13] : memref<256x64xbf16, #tpu.memory_space<vmem>>, vector<256x64xbf16>
    %cst_14 = arith.constant dense<0.000000e+00> : vector<8x64xf32>
    %19 = tpu.matmul %17, %18, %cst_14 {dimension_numbers = #tpu.dot_dimension_numbers<[1], [0], [0], [1], [0, 0, 1, 1], [], []>} : vector<8x256xbf16>, vector<256x64xbf16>, vector<8x64xf32> -> vector<8x64xf32>
    %c0_15 = arith.constant 0 : index
    %c0_16 = arith.constant 0 : index
    %20 = vector.load %arg7[%c0_15, %c0_16] : memref<1x64xf32, #tpu.memory_space<vmem>>, vector<1x64xf32>
    %21 = vector.broadcast %20 : vector<1x64xf32> to vector<8x64xf32>
    %22 = arith.addf %19, %21 : vector<8x64xf32>
    %23 = math.tanh %22 : vector<8x64xf32>
    %c0_17 = arith.constant 0 : index
    %c0_18 = arith.constant 0 : index
    %24 = vector.load %arg8[%c0_17, %c0_18] : memref<8x64xf32, #tpu.memory_space<vmem>>, vector<8x64xf32>
    tpu.vector_store %arg8[%c0_17, %c0_18], %23 {strides = array<i32>} : memref<8x64xf32, #tpu.memory_space<vmem>>, vector<8x64xf32>,
    return
  }
  func.func @transform_0(%arg0: i32) -> (i32, i32) {
    %c0_i32 = arith.constant 0 : i32
    %c0_i32_0 = arith.constant 0 : i32
    return %arg0, %c0_i32 : i32, i32
  }
  func.func @transform_1(%arg0: i32) -> (i32, i32) {
    %c0_i32 = arith.constant 0 : i32
    %c0_i32_0 = arith.constant 0 : i32
    %c0_i32_1 = arith.constant 0 : i32
    return %c0_i32, %c0_i32_0 : i32, i32
  }
  func.func @transform_2(%arg0: i32) -> (i32, i32) {
    %c0_i32 = arith.constant 0 : i32
    %c0_i32_0 = arith.constant 0 : i32
    %c0_i32_1 = arith.constant 0 : i32
    return %c0_i32, %c0_i32_0 : i32, i32
  }
  func.func @transform_3(%arg0: i32) -> (i32, i32) {
    %c0_i32 = arith.constant 0 : i32
    %c0_i32_0 = arith.constant 0 : i32
    %c0_i32_1 = arith.constant 0 : i32
    return %c0_i32, %c0_i32_0 : i32, i32
  }
  func.func @transform_4(%arg0: i32) -> (i32, i32) {
    %c0_i32 = arith.constant 0 : i32
    %c0_i32_0 = arith.constant 0 : i32
    %c0_i32_1 = arith.constant 0 : i32
    return %c0_i32, %c0_i32_0 : i32, i32
  }
  func.func @transform_5(%arg0: i32) -> (i32, i32) {
    %c0_i32 = arith.constant 0 : i32
    %c0_i32_0 = arith.constant 0 : i32
    %c0_i32_1 = arith.constant 0 : i32
    return %c0_i32, %c0_i32_0 : i32, i32
  }
  func.func @transform_6(%arg0: i32) -> (i32, i32) {
    %c0_i32 = arith.constant 0 : i32
    %c0_i32_0 = arith.constant 0 : i32
    %c0_i32_1 = arith.constant 0 : i32
    return %c0_i32, %c0_i32_0 : i32, i32
  }
  func.func @transform_7(%arg0: i32) -> (i32, i32) {
    %c0_i32 = arith.constant 0 : i32
    %c0_i32_0 = arith.constant 0 : i32
    return %arg0, %c0_i32 : i32, i32
  }
}

</mosaic_0001>

<bundles_post_ra>
// kernel: tpu_custom_call.1
= control target key start
LH: loop header
LB: loop body
LE: loop exit
PB: predicated region body
PF: predicated region fallthrough
CT: control target
= control target key end

     0   :  { %v586_v1 = vmov 0.0   ;;  %vm587_vm0 = vmmov 0   ;;  %vm53_vm1 = vcmask 261120   ;;  %s756_s0 = inlined_call_operand.vmem [shape: f32[8,32], index: 0, kind: input, shape index: {}]   ;;  %s757_s1 = inlined_call_operand.vmem [shape: bf16[32,128], index: 1, kind: input, shape index: {}]   ;;  %s758_s2 = inlined_call_operand.vmem [shape: f32[1,128], index: 2, kind: input, shape index: {}]   ;;  %s759_s3 = inlined_call_operand.vmem [shape: bf16[128,256], index: 3, kind: input, shape index: {}]   ;;  %s760_s4 = inlined_call_operand.vmem [shape: f32[1,256], index: 4, kind: input, shape index: {}]   ;;  %s761_s5 = inlined_call_operand.vmem [shape: bf16[256,64], index: 5, kind: input, shape index: {}]   ;;  %s762_s6 = inlined_call_operand.vmem [shape: f32[1,64], index: 6, kind: input, shape index: {}]   ;;  %s763_s7 = inlined_call_operand.hbm [shape: f32[8,64], index: 7, kind: output, shape index: {}]  }
   0x1   :  { %v518_v0 = vld [vmem:[%s757_s1] sm:$0xff]   ;;  %506 = vmatprep.subr.bf16.mxu0 %v586_v1  ;;  %v519_v2 = vld [vmem:[%s757_s1 + $0x8] sm:$0xff]   ;;  %510 = vmatprep.mubr.msk.bf16.mxu0 %vm587_vm0, %v586_v1  ;;  %v523_v6 = vld [vmem:[%s759_s3 + $0x14] ss:$8 sps:$4 sm:$0xff]  }
   0x2   :  { %507 = vmatpush3.bf16.msra.mxu0 %v518_v0  ;;  %v28_v3 = vld [vmem:[%s756_s0] sm:$0xff]  ;;  %v525_v8 = vld [vmem:[%s759_s3 + $0x10] ss:$8 sps:$4 sm:$0xff]   ;;  %v529_v11 = vld [vmem:[%s759_s3 + $0x34] ss:$8 sps:$4 sm:$0xff]  }
   0x3   :  { %508 = vmatprep.subr.bf16.mxu0 %v586_v1  ;;  %v520_v4 = vld [vmem:[%s759_s3 + $0x4] ss:$8 sps:$4 sm:$0xff]   ;;  %v522_v5 = vld [vmem:[%s759_s3] ss:$8 sps:$4 sm:$0xff]   ;;  %v29_v7 = vpack.c.bf16 %v28_v3, %v28_v3  ;;  %v531_v12 = vld [vmem:[%s759_s3 + $0x30] ss:$8 sps:$4 sm:$0xff]  }
   0x4   :  { %207 = vmatprep.subr.bf16.mxu1 %v520_v4  ;;  %v526_v9 = vld [vmem:[%s759_s3 + $0x24] ss:$8 sps:$4 sm:$0xff]   ;;  %v528_v10 = vld [vmem:[%s759_s3 + $0x20] ss:$8 sps:$4 sm:$0xff]   ;;  %v535_v15 = vld [vmem:[%s759_s3 + $0x54] ss:$8 sps:$4 sm:$0xff]  }
   0x5   :  { %208 = vmatpush1.bf16.msra.mxu1 %v522_v5  ;;  %v532_v13 = vld [vmem:[%s759_s3 + $0x44] ss:$8 sps:$4 sm:$0xff]   ;;  %v534_v14 = vld [vmem:[%s759_s3 + $0x40] ss:$8 sps:$4 sm:$0xff]   ;;  %v537_v16 = vld [vmem:[%s759_s3 + $0x50] ss:$8 sps:$4 sm:$0xff]  }
   0x6   :  { %509 = vmatpush3.bf16.msra.mxu0 %v519_v2  ;;  %209 = vmatprep.subr.bf16.mxu1 %v523_v6  ;;  %v538_v17 = vld [vmem:[%s759_s3 + $0x64] ss:$8 sps:$4 sm:$0xff]  }
   0x9   :  { %511 = vmatmul.mubr.msk.bf16.vlgmr.msra.gmra.mrb[0].mxu0 %vm53_vm1, %v29_v7  ;;  %210 = vmatpush1.bf16.msra.mxu1 %v525_v8 }
   0xa   :  { %211 = vmatprep.subr.bf16.mxu1 %v526_v9 }
   0xd   :  { %212 = vmatpush1.bf16.msra.mxu1 %v528_v10 }
   0xe   :  { %213 = vmatprep.subr.bf16.mxu1 %v529_v11 }
  0x11   :  { %214 = vmatpush1.bf16.msra.mxu1 %v531_v12 }
  0x12   :  { %215 = vmatprep.subr.bf16.mxu1 %v532_v13 }
  0x15   :  { %216 = vmatpush1.bf16.msra.mxu1 %v534_v14 }
  0x16   :  { %217 = vmatprep.subr.bf16.mxu1 %v535_v15 }
  0x17   :  { %12 = vsyncpa [#allocation3], 0  ;;  %v540_v18 = vld [vmem:[%s759_s3 + $0x60] ss:$8 sps:$4 sm:$0xff]   ;;  %v541_v19 = vld [vmem:[%s759_s3 + $0x74] ss:$8 sps:$4 sm:$0xff]   ;;  %v117_v46 = vlaneseq }
  0x18   :  { %v543_v20 = vld [vmem:[%s759_s3 + $0x70] ss:$8 sps:$4 sm:$0xff]   ;;  %v588_v21 = vmov 0   ;;  %v544_v22 = vld [vmem:[%s761_s5 + $0x40] sm:$0xff]   ;;  %v546_v24 = vld [vmem:[%s761_s5 + $0x48] sm:$0xff]   ;;  %vm428_vm2 = vcmask 523264  }
  0x19   :  { %218 = vmatpush1.bf16.msra.mxu1 %v537_v16  ;;  %239 = vmatprep.mubr.bf16.mxu1 %v588_v21  ;;  %v545_v23 = vld [vmem:[%s761_s5] sm:$0xff]   ;;  %v547_v25 = vld [vmem:[%s761_s5 + $0x8] sm:$0xff]   ;;  %v548_v26 = vld [vmem:[%s761_s5 + $0x50] sm:$0xff]   ;;  %v118_v47 = vshrl.u32 %v117_v46, 7 }
  0x1a   :  { %219 = vmatprep.subr.bf16.mxu1 %v538_v17  ;;  %484 = vmatprep.subr.bf16.mxu0 %v544_v22  ;;  %v549_v27 = vld [vmem:[%s761_s5 + $0x10] sm:$0xff]   ;;  %v550_v28 = vld [vmem:[%s761_s5 + $0x58] sm:$0xff]   ;;  %v552_v30 = vld [vmem:[%s761_s5 + $0x60] sm:$0xff]  }
  0x1b   :  { %485 = vmatpush3.bf16.msra.mxu0 %v545_v23  ;;  %v551_v29 = vld [vmem:[%s761_s5 + $0x18] sm:$0xff]   ;;  %v553_v31 = vld [vmem:[%s761_s5 + $0x20] sm:$0xff]   ;;  %v554_v32 = vld [vmem:[%s761_s5 + $0x68] sm:$0xff]   ;;  %v119_v48 = vsub.s32 0, %v118_v47  ;;  %v123_v50 = vsub.s32 1, %v118_v47 }
  0x1c   :  { %486 = vmatprep.subr.bf16.mxu0 %v546_v24  ;;  %v555_v33 = vld [vmem:[%s761_s5 + $0x28] sm:$0xff]   ;;  %v444_v34 = vld [vmem:[%s758_s2] ss:$0 sm:$0xff]  ;;  %v556_v42 = vld [vmem:[%s761_s5 + $0x70] sm:$0xff]  }
  0x1d   :  { %220 = vmatpush1.bf16.msra.mxu1 %v540_v18  ;;  %v557_v43 = vld [vmem:[%s761_s5 + $0x30] sm:$0xff]   ;;  %v558_v44 = vld [vmem:[%s761_s5 + $0x78] sm:$0xff]   ;;  %v115_v49 = vld [vmem:[%s760_s4] sm:$0x3]  ;;  %s589_s4 = smov [#allocation2]  }
  0x1e   :  { %221 = vmatprep.subr.bf16.mxu1 %v541_v19  ;;  %v559_v45 = vld [vmem:[%s761_s5 + $0x38] sm:$0xff]   ;;  %v120_v51 = vrot.slane %v115_v49, %v119_v48  ;;  %v124_v52 = vrot.slane %v115_v49, %v123_v50  ;;  %v464_v0 = vld [vmem:[%s762_s6] ss:$0 sm:$0xff]  ;;  %s436_s21 = sshll.u32 %s589_s4, 4  ;;  %s437_s21 = int_to_ptr.vmem [resolvable:$true] %s436_s21 }
  0x1f   :  { %487 = vmatpush3.bf16.msra.mxu0 %v547_v25  ;;  %s562_s22 = scalar_lea.vmem %s437_s21, 128  ;;  %p567_p1 = scmp.lt.s32.totalorder %s437_s21, %s437_s21 }
  0x20   :  { %488 = vmatprep.subr.bf16.mxu0 %v548_v26  ;;  %p563_p0 = scmp.ne.s32.totalorder %s437_s21, %s562_s22  ;;  %p568_p2 = scmp.lt.s32.totalorder %s562_s22, %s562_s22 }
  0x21   :  { %222 = vmatpush1.bf16.msra.mxu1 %v543_v20 }
  0x22   :  { %p569_p3 = por %p568_p2, %p567_p1 }
  0x23   :  { %489 = vmatpush3.bf16.msra.mxu0 %v549_v27 }
  0x24   :  { %490 = vmatprep.subr.bf16.mxu0 %v550_v28  ;;  %p570_p4 = pnand %p569_p3, %p563_p0 }
  0x27   :  { %491 = vmatpush3.bf16.msra.mxu0 %v551_v29 }
  0x28   :  { %492 = vmatprep.subr.bf16.mxu0 %v552_v30 }
  0x2b   :  { %493 = vmatpush3.bf16.msra.mxu0 %v553_v31 }
  0x2c   :  { %494 = vmatprep.subr.bf16.mxu0 %v554_v32 }
  0x2f   :  { %495 = vmatpush3.bf16.msra.mxu0 %v555_v33 }
  0x30   :  { %496 = vmatprep.subr.bf16.mxu0 %v556_v42 }
  0x33   :  { %497 = vmatpush3.bf16.msra.mxu0 %v557_v43 }
  0x34   :  { %498 = vmatprep.subr.bf16.mxu0 %v558_v44 }
  0x37   :  { %499 = vmatpush3.bf16.msra.mxu0 %v559_v45 }
  0xdc   :  { %v91_v35 = vpop.f32.mrb[0].mxu0 }
  0xdd   :  { %v92_v36 = vadd.f32 %v444_v34, %v91_v35  ;;  %v512_v37 = vpop.f32.mrb[1].mxu0 }
  0xde   :  { %v94_v38 = vpop.f32.mrb[2].mxu0 }
  0xdf   :  { %v97_v39 = vmax.f32 %v92_v36, 0.0  ;;  %v513_v40 = vpop.f32.mrb[3].mxu0 }
  0xe1   :  { %v98_v41 = vpack.c.bf16 %v97_v39, %v97_v39 }
  0xe3   :  { %240 = vmatmul.mubr.bf16.vlgmr.msra.gmra.mrb[0].mxu1 %v98_v41 }
 0x1b6   :  { %v241_v53 = vpop.f32.mrb[0].mxu1 }
 0x1b7   :  { %v242_v54 = vadd.f32 %v241_v53, %v120_v51  ;;  %v243_v55 = vpop.f32.mrb[1].mxu1 }
 0x1b8   :  { %v244_v56 = vadd.f32 %v243_v55, %v124_v52  ;;  %v245_v57 = vpop.f32.mrb[2].mxu1 }
 0x1b9   :  { %v248_v58 = vmax.f32 %v242_v54, 0.0  ;;  %v246_v59 = vpop.f32.mrb[3].mxu1 }
 0x1ba   :  { %v249_v60 = vmax.f32 %v244_v56, 0.0 }
 0x1bb   :  { %v250_v62 = vpack.c.bf16 %v248_v58, %v248_v58 }
 0x1bc   :  { %v251_v61 = vpack.c.bf16 %v249_v60, %v249_v60 }
 0x1be   :  { %419 = vmatprep.mubr.bf16.mxu0 %v251_v61 }
 0x1bf   :  { %420 = vmatmul.mubr.bf16.vlgmr.msra.gmra.mrb[4].mxu0 %v250_v62 }
 0x292   :  { %v500_v63 = vpop.f32.mrb[4].mxu0 }
 0x293   :  { %v501_v1 = vpop.f32.mrb[5].mxu0 }
 0x294   :  { %v502_v2 = vadd.f32 %v501_v1, %v500_v63  ;;  %v503_v3 = vpop.f32.mrb[6].mxu0 }
 0x295   :  { %v504_v4 = vpop.f32.mrb[7].mxu0 }
 0x296   :  { %v422_v5 = vadd.f32 %v502_v2, %v464_v0 }
 0x298   :  { %560 = vtanh.f32 %v422_v5 }
 0x2a2   :  { %v561_v6 = vpop.eup %560 }
 0x2a3   :  { %429 = vst.msk [vmem:[#allocation2] sm:$0xff] %vm428_vm2, %v561_v6 }
 0x2a4   :  { %573 = shalt.err (!%p570_p4)
}
 0x2a5   :  { %s574_s24 = scalar_lea.hbm %s763_s7, 128 }
 0x2a6   :  { %p575_p5 = scmp.ne.s32.totalorder %s763_s7, %s574_s24  ;;  %p578_p6 = scmp.lt.u32.totalorder %s574_s24, %s763_s7 }
 0x2a8   :  { %p580_p7 = pnand %p578_p6, %p575_p5 }
 0x2aa   :  { %583 = shalt.err (!%p580_p7)
}
 0x2ab   :  { %439 = dma.vmem_to_hbm [thread:$0]  %s437_s21, 128, %s763_s7, [#allocation3]  }
 0x2ac   :  { %584 = dma.done.wait [#allocation3], 128  }
 0x2ad   :  { %585 = vsyncadd [#allocation3], 4294967168 }
 0x2ae   :  { %443 = vsyncpa [#allocation3], 1 }

</bundles_post_ra>
